<compile_context>
chip_gen: v5e
topology: v5e:2x2
jax: 0.10.0
libtpu: 0.0.40
codegen_flags: <defaults>
</compile_context>

<pallas_src>
import math

import jax
import jax.numpy as jnp
from jax.experimental import pallas as pl
from jax.experimental.pallas import tpu as pltpu


def _round_up(v, m):
    return ((v + m - 1) // m) * m


def _mlp_kernel(x_ref, w1_ref, b1_ref, w2_ref, b2_ref, o_ref):
    # x_ref : [tile_m, dim_input]    batch tile of activations (natural layout)
    # w1_ref: [dim_input, dim_model] first-layer weight
    # b1_ref: [1, dim_model]         first-layer bias (row)
    # w2_ref: [1, dim_model]         second-layer weight (row)
    # b2_ref: [1, 1]                 second-layer bias, in SMEM
    # o_ref : [tile_m, 1]            output column for this batch tile
    h = jnp.dot(x_ref[...], w1_ref[...], preferred_element_type=jnp.float32)
    h = jnp.maximum(h + b1_ref[...], 0.0)                  # VPU bias + ReLU
    # Second layer (dim_model -> 1): VPU multiply + cross-lane (XLU) reduce,
    # avoiding an N=1 MXU matmul.
    y = jnp.sum(h * w2_ref[...], axis=-1, keepdims=True)   # [tile_m, 1]
    o_ref[...] = (y + b2_ref[0, 0]).astype(o_ref.dtype)


def prepare_params(w1, b1, w2, b2):
    """One-time, reshape-only param prep (hoist out of the per-call path
    when the same net is evaluated many times)."""
    f32 = jnp.float32
    return (jnp.asarray(w1, f32),                    # [di, dm]
            jnp.asarray(b1, f32).reshape(1, -1),     # [1, dm]
            jnp.asarray(w2, f32).reshape(1, -1),     # [1, dm] (free reshape of [dm,1])
            jnp.asarray(b2, f32).reshape(1, 1))      # [1, 1]  (SMEM scalar)


def _choose_tile_m(B, dim_input, dim_model, vmem_budget):
    """Batch tile: >= ~512 KiB of x per DMA, >= 2 grid steps when the batch
    allows it (v7x has 2 TensorCores), bounded by a conservative VMEM estimate."""
    if B <= 128:
        return _round_up(B, 8)                       # one small tile
    b128 = _round_up(B, 128)
    tile = _round_up(max(512, (512 * 1024) // max(4 * dim_input, 4)), 128)
    tile = min(tile, b128)
    tile = min(tile, _round_up(b128 // 2, 128))      # keep >= 2 grid steps
    # VMEM cap (conservative: lane dims pad to 128 in the VMEM layout).
    di_l = _round_up(dim_input, 128)
    dm_l = _round_up(dim_model, 128)
    weight_bytes = 4 * (_round_up(dim_input, 8) * dm_l + 2 * dm_l)
    per_row = 4 * (2 * di_l + 2 * dm_l + 2 * 128)    # x(2-buf) + h + out(2-buf)
    avail = max(vmem_budget - weight_bytes, per_row * 128)
    cap = max(128, (avail // per_row) // 128 * 128)
    return max(128, min(tile, cap))


def ground_truth_net(x, w1, b1, w2, b2, *, tile_m=None):
    """Pallas forward pass of GroundTruthNet: relu(x @ w1 + b1) @ w2 + b2.

    Args:
      x:  [B, dim_input] float32
      w1: [dim_input, dim_model] float32  (transposed PyTorch linear weight)
      b1: [dim_model] float32
      w2: [dim_model, 1] float32
      b2: [1] float32
    Returns:
      [B, 1] float32
    """
    B, dim_input = x.shape
    dim_model = w1.shape[1]
    f32 = jnp.float32
    if x.dtype != f32:
        x = x.astype(f32)
    w1r, b1r, w2r, b2s = prepare_params(w1, b1, w2, b2)

    # Generation-aware VMEM budget (128 MiB on v5e/v6e, 64 MiB on v7x).
    try:
        vmem_cap = int(pltpu.get_tpu_info().vmem_capacity_bytes)
    except Exception:
        vmem_cap = 64 * 1024 * 1024
    vmem_budget = (vmem_cap * 3) // 4                # leave headroom

    if tile_m is None:
        tile_m = _choose_tile_m(B, dim_input, dim_model, vmem_budget)
    tile_m = max(8, _round_up(int(tile_m), 8))

    grid = (pl.cdiv(B, tile_m),)                     # ragged last tile is fine

    # Rough per-call VMEM need (conservative lane padding) -> vmem limit.
    di_l = _round_up(dim_input, 128)
    dm_l = _round_up(dim_model, 128)
    need = 4 * (_round_up(dim_input, 8) * dm_l + 2 * dm_l
                + tile_m * (2 * di_l + 2 * dm_l + 2 * 128))
    vmem_limit = int(min(vmem_budget, max(2 * need, 32 * 1024 * 1024)))

    cost = pl.CostEstimate(
        flops=int(2 * B * dim_input * dim_model + 4 * B * dim_model),
        transcendentals=0,
        bytes_accessed=int(4 * (B * dim_input + dim_input * dim_model
                                + 2 * dim_model + B + 1)),
    )

    out = pl.pallas_call(
        _mlp_kernel,
        out_shape=jax.ShapeDtypeStruct((B, 1), f32),
        grid_spec=pltpu.PrefetchScalarGridSpec(
            num_scalar_prefetch=0,
            grid=grid,
            in_specs=[
                # x in its natural [B, dim_input] layout; last dim == full
                # array extent (legal even when < 128); batch tiles pipelined.
                pl.BlockSpec((tile_m, dim_input), lambda i: (i, 0)),
                # Grid-invariant weights / biases: single-buffered.
                pl.BlockSpec((dim_input, dim_model), lambda i: (0, 0),
                             pipeline_mode=pl.Buffered(1)),
                pl.BlockSpec((1, dim_model), lambda i: (0, 0),
                             pipeline_mode=pl.Buffered(1)),
                pl.BlockSpec((1, dim_model), lambda i: (0, 0),
                             pipeline_mode=pl.Buffered(1)),
                # Scalar second-layer bias lives in SMEM.
                pl.BlockSpec(memory_space=pltpu.MemorySpace.SMEM),
            ],
            out_specs=pl.BlockSpec((tile_m, 1), lambda i: (i, 0)),
        ),
        compiler_params=pltpu.CompilerParams(
            dimension_semantics=("parallel",),  # batch tiles shard across TCs
            vmem_limit_bytes=vmem_limit,
        ),
        cost_estimate=cost,
    )(x, w1r, b1r, w2r, b2s)

    # TODO(synk): add a K-tiling grid axis over dim_input (f32 accumulator +
    # pl.when init/finalize) if dim_input*dim_model*4 ever approaches ~half of
    # VMEM (matters first on v7x's 64 MiB per TensorCore).
    return out


def init_params(key, dim_input, dim_model):
    """Deterministic init matching GroundTruthNet.__init__ semantics:
    weights (dim>1) ~ U(-3, 3); biases keep nn.Linear default U(-1/sqrt(fan_in), ...)."""
    k1, k2, k3, k4 = jax.random.split(key, 4)
    w1 = jax.random.uniform(k1, (dim_input, dim_model), jnp.float32, -3.0, 3.0)
    w2 = jax.random.uniform(k2, (dim_model, 1), jnp.float32, -3.0, 3.0)
    bound1 = 1.0 / math.sqrt(dim_input)
    bound2 = 1.0 / math.sqrt(dim_model)
    b1 = jax.random.uniform(k3, (dim_model,), jnp.float32, -bound1, bound1)
    b2 = jax.random.uniform(k4, (1,), jnp.float32, -bound2, bound2)
    return w1, b1, w2, b2


if __name__ == "__main__":
    key = jax.random.PRNGKey(0)
    k_x, k_p = jax.random.split(key)

    B, dim_input, dim_model = 8, 16, 32
    x = jax.random.normal(k_x, (B, dim_input), jnp.float32)
    w1, b1, w2, b2 = init_params(k_p, dim_input, dim_model)

    out = ground_truth_net(x, w1, b1, w2, b2)
    out = jax.block_until_ready(out)

    # Pure-JAX reference check.
    ref = jnp.maximum(x @ w1 + b1, 0.0) @ w2 + b2
    assert out.shape == (B, 1)
    assert jnp.allclose(out, ref, atol=1e-4, rtol=1e-4)

    print("KERNEL_OK")
</pallas_src>

<mosaic_0001>
module attributes {stable_mosaic.version = 11 : i64} {
  func.func @_mlp_kernel(%arg0: i32, %arg1: memref<8x16xf32, #tpu.memory_space<vmem>>, %arg2: memref<16x32xf32, #tpu.memory_space<vmem>>, %arg3: memref<1x32xf32, #tpu.memory_space<vmem>>, %arg4: memref<1x32xf32, #tpu.memory_space<vmem>>, %arg5: memref<1x1xf32, #tpu.memory_space<smem>>, %arg6: memref<8x1xf32, #tpu.memory_space<vmem>>) attributes {dimension_semantics = [#tpu.dimension_semantics<parallel>], iteration_bounds = array<i64: 1>, scalar_prefetch = 0 : i64, scratch_operands = 0 : i64, tpu.core_type = #tpu.core_type<tc>, window_params = [{transform_indices = @transform_0, window_bounds = array<i64: 8, 16>}, {pipeline_mode = #tpu.pipeline_mode<synchronous>, transform_indices = @transform_1, window_bounds = array<i64: 16, 32>}, {pipeline_mode = #tpu.pipeline_mode<synchronous>, transform_indices = @transform_2, window_bounds = array<i64: 1, 32>}, {pipeline_mode = #tpu.pipeline_mode<synchronous>, transform_indices = @transform_3, window_bounds = array<i64: 1, 32>}, {transform_indices = @transform_4, window_bounds = array<i64: 1, 1>}, {transform_indices = @transform_5, window_bounds = array<i64: 8, 1>}]} {
    %c0 = arith.constant 0 : index
    %c0_0 = arith.constant 0 : index
    %0 = vector.load %arg1[%c0, %c0_0] : memref<8x16xf32, #tpu.memory_space<vmem>>, vector<8x16xf32>
    %c0_1 = arith.constant 0 : index
    %c0_2 = arith.constant 0 : index
    %1 = vector.load %arg2[%c0_1, %c0_2] : memref<16x32xf32, #tpu.memory_space<vmem>>, vector<16x32xf32>
    %cst = arith.constant dense<0.000000e+00> : vector<8x32xf32>
    %2 = tpu.matmul %0, %1, %cst {dimension_numbers = #tpu.dot_dimension_numbers<[1], [0], [0], [1], [0, 0, 1, 1], [], []>} : vector<8x16xf32>, vector<16x32xf32>, vector<8x32xf32> -> vector<8x32xf32>
    %c0_3 = arith.constant 0 : index
    %c0_4 = arith.constant 0 : index
    %3 = vector.load %arg3[%c0_3, %c0_4] : memref<1x32xf32, #tpu.memory_space<vmem>>, vector<1x32xf32>
    %4 = vector.broadcast %3 : vector<1x32xf32> to vector<8x32xf32>
    %5 = arith.addf %2, %4 : vector<8x32xf32>
    %cst_5 = arith.constant 0.000000e+00 : f32
    %6 = vector.broadcast %cst_5 : f32 to vector<8x32xf32>
    %7 = arith.maximumf %5, %6 : vector<8x32xf32>
    %c0_6 = arith.constant 0 : index
    %c0_7 = arith.constant 0 : index
    %8 = vector.load %arg4[%c0_6, %c0_7] : memref<1x32xf32, #tpu.memory_space<vmem>>, vector<1x32xf32>
    %9 = vector.broadcast %8 : vector<1x32xf32> to vector<8x32xf32>
    %10 = arith.mulf %7, %9 : vector<8x32xf32>
    %cst_8 = arith.constant dense<0.000000e+00> : vector<8xf32>
    %11 = vector.multi_reduction <add>, %10, %cst_8 [1] : vector<8x32xf32> to vector<8xf32>
    %12 = vector.shape_cast %11 : vector<8xf32> to vector<8x1xf32>
    %c0_9 = arith.constant 0 : index
    %c0_10 = arith.constant 0 : index
    %13 = memref.load %arg5[%c0_9, %c0_10] : memref<1x1xf32, #tpu.memory_space<smem>>
    %14 = vector.broadcast %13 : f32 to vector<8x1xf32>
    %15 = arith.addf %12, %14 : vector<8x1xf32>
    %c0_11 = arith.constant 0 : index
    %c0_12 = arith.constant 0 : index
    %16 = vector.load %arg6[%c0_11, %c0_12] : memref<8x1xf32, #tpu.memory_space<vmem>>, vector<8x1xf32>
    tpu.vector_store %arg6[%c0_11, %c0_12], %15 {strides = array<i32>} : memref<8x1xf32, #tpu.memory_space<vmem>>, vector<8x1xf32>,
    return
  }
  func.func @transform_0(%arg0: i32) -> (i32, i32) {
    %c0_i32 = arith.constant 0 : i32
    %c0_i32_0 = arith.constant 0 : i32
    return %arg0, %c0_i32 : i32, i32
  }
  func.func @transform_1(%arg0: i32) -> (i32, i32) {
    %c0_i32 = arith.constant 0 : i32
    %c0_i32_0 = arith.constant 0 : i32
    %c0_i32_1 = arith.constant 0 : i32
    return %c0_i32, %c0_i32_0 : i32, i32
  }
  func.func @transform_2(%arg0: i32) -> (i32, i32) {
    %c0_i32 = arith.constant 0 : i32
    %c0_i32_0 = arith.constant 0 : i32
    %c0_i32_1 = arith.constant 0 : i32
    return %c0_i32, %c0_i32_0 : i32, i32
  }
  func.func @transform_3(%arg0: i32) -> (i32, i32) {
    %c0_i32 = arith.constant 0 : i32
    %c0_i32_0 = arith.constant 0 : i32
    %c0_i32_1 = arith.constant 0 : i32
    return %c0_i32, %c0_i32_0 : i32, i32
  }
  func.func @transform_4(%arg0: i32) -> (i32, i32) {
    %c0_i32 = arith.constant 0 : i32
    %c0_i32_0 = arith.constant 0 : i32
    %c0_i32_1 = arith.constant 0 : i32
    return %c0_i32, %c0_i32_0 : i32, i32
  }
  func.func @transform_5(%arg0: i32) -> (i32, i32) {
    %c0_i32 = arith.constant 0 : i32
    %c0_i32_0 = arith.constant 0 : i32
    return %arg0, %c0_i32 : i32, i32
  }
}

</mosaic_0001>

<bundles_post_ra>
// kernel: tpu_custom_call.1
= control target key start
LH: loop header
LB: loop body
LE: loop exit
PB: predicated region body
PF: predicated region fallthrough
CT: control target
= control target key end

     0   :  { %11 = vsyncpa [#allocation4], 0  ;;  %s214_s0 = inlined_call_operand.hbm [shape: f32[8,16], index: 0, kind: input, shape index: {}]   ;;  %s215_s1 = inlined_call_operand.hbm [shape: f32[16,32], index: 1, kind: input, shape index: {}]   ;;  %s216_s2 = inlined_call_operand.vmem [shape: f32[1,32], index: 2, kind: input, shape index: {}]   ;;  %s217_s3 = inlined_call_operand.vmem [shape: f32[1,32], index: 3, kind: input, shape index: {}]   ;;  %s218_s4 = inlined_call_operand.<no memory space> [shape: f32[1,1], index: 4, kind: input, shape index: {}]   ;;  %s219_s5 = inlined_call_operand.vmem [shape: f32[8,1], index: 5, kind: output, shape index: {}]  }
   0x1   :  { %s18_s20 = sshll.u32 %s214_s0, 4  ;;  %s19_s20 = int_to_ptr.hbm [resolvable:$true] %s18_s20 }
   0x2   :  { %12 = vsyncpa [#allocation6], 0  ;;  %s162_s21 = smov [#allocation3]   ;;  %s28_s25 = sshll.u32 %s215_s1, 4  ;;  %s29_s25 = int_to_ptr.hbm [resolvable:$true] %s28_s25 }
   0x3   :  { %s20_s22 = sshll.u32 %s162_s21, 4  ;;  %s163_s26 = smov [#allocation5]   ;;  %s21_s22 = int_to_ptr.vmem [resolvable:$true] %s20_s22 }
   0x4   :  { %23 = dma.hbm_to_vmem [thread:$0]  %s19_s20, 128, %s21_s22, [#allocation4]  }
   0x5   :  { %s30_s27 = sshll.u32 %s163_s26, 4  ;;  %s164_s28 = smov 128   ;;  %s31_s27 = int_to_ptr.vmem [resolvable:$true] %s30_s27 }
   0x6   :  { %s165_s29 = smov 8  }
   0x7   :  { %36 = dma.hbm_to_vmem [thread:$0]  %s29_s25, 256, %s31_s27, [#allocation6], %s164_s28, %s164_s28, %s165_s29  }
   0x8   :  { %158 = dma.done.wait [#allocation4], 128  }
   0x9   :  { %159 = vsyncadd [#allocation4], 4294967168 }
   0xa   :  { %160 = dma.done.wait [#allocation6], 256  }
   0xb   :  { %161 = vsyncadd [#allocation6], 4294967040  ;;  %v53_v0 = vld [vmem:[#allocation5 + $0x8] sm:$0xff]  ;;  %v52_v1 = vld [vmem:[#allocation5] sm:$0xff]  ;;  %vm58_vm0 = vcmask 130048   ;;  %vm88_vm1 = vcmask 261120   ;;  %v93_v10 = vstv %s218_s4 }
   0xc   :  { %76 = vmatpush.msra.mxu0 %v53_v0  ;;  %v51_v2 = vld [vmem:[#allocation3] sm:$0xff]  ;;  %vm95_vm2 = vcmask 7168  }
   0xd   :  { %v108_v3 = vld [vmem:[%s216_s2] ss:$0 sm:$0xff] }
   0xe   :  { %77 = vmatpush.msra.mxu0 %v52_v1  ;;  %v109_v6 = vld [vmem:[%s217_s3] ss:$0 sm:$0xff] }
   0xf   :  { %103 = vmatmul.msk.f32.vlgmr.msra.gmra.mxu0 %vm58_vm0, %v51_v2 }
  0x8c   :  { %v79_v4 = vpop.f32.mrf.mxu0 }
  0x8d   :  { %v80_v5 = vadd.f32 %v108_v3, %v79_v4 }
  0x8f   :  { %v82_v7 = vmax.f32 %v80_v5, 0.0 }
  0x91   :  { %v87_v8 = vmul.f32 %v109_v6, %v82_v7 }
  0x93   :  { %v89_v9 = vsel %vm88_vm1, %v87_v8, 0.0 }
  0x94   :  { %90 = vadd.xlane.f32.xlu0 %v89_v9 }
 0x107   :  { %v91_v11 = vpop.xlane.xlu0 %90 }
 0x108   :  { %v94_v12 = vadd.f32 %v93_v10, %v91_v11 }
 0x10a   :  { %96 = vst.msk [vmem:[%s219_s5] sm:$0xff] %vm95_vm2, %v94_v12 }
 0x10b   :  { %101 = vsyncpa [#allocation4], 1 }
 0x10c   :  { %102 = vsyncpa [#allocation6], 1 }

</bundles_post_ra>
